<compile_context>
chip_gen: v7x
topology: tpu7x:2x2x1
jax: 0.10.0
libtpu: 0.0.40
codegen_flags: <defaults>
</compile_context>

<pallas_src>
import functools

import jax
import jax.numpy as jnp
from jax.experimental import pallas as pl
from jax.experimental.pallas import tpu as pltpu

SQRT_2 = 1.4142135623730951
_LANE = 128


# --------------------------------------------------------------------------------------
# helpers
# --------------------------------------------------------------------------------------
def _round_up(x, m):
    return ((x + m - 1) // m) * m


def _tpu_info():
    try:
        return pltpu.get_tpu_info()
    except Exception:
        return None


def _num_tensorcores():
    """Best-effort TensorCore-per-chip count (v7x = 2, v5e/v6e = 1)."""
    info = _tpu_info()
    if info is not None:
        for attr in ("num_cores", "tensorcores_per_chip", "num_tensorcores", "core_count"):
            n = getattr(info, attr, None)
            if n:
                try:
                    return max(1, int(n))
                except Exception:
                    pass
    try:
        if "v7" in jax.devices()[0].device_kind.lower():
            return 2
    except Exception:
        pass
    return 1


def _vmem_budget_bytes():
    """Usable VMEM budget for picking the batch tile (leave generous headroom)."""
    cap = None
    info = _tpu_info()
    if info is not None:
        for attr in ("vmem_capacity_bytes", "vmem_bytes", "vmem_size_bytes"):
            v = getattr(info, attr, None)
            if v:
                try:
                    cap = int(v)
                    break
                except Exception:
                    pass
    if cap is None:
        cap = 64 << 20  # conservative: v7x per-TC physical VMEM
    return min(cap // 2, 32 << 20)


def _pick_tb(B, *, bytes_per_row, resident_weight_bytes, row_mult, num_cores):
    """VMEM-budget-driven batch tile.

    - v5e/v6e (1 TC): the grid is a purely serial loop, so collapse to as few, fat
      steps as VMEM allows (1 step when the whole batch fits).
    - v7x (2 TCs): keep `num_cores` grid steps so dimension_semantics=("parallel",)
      shards across cores, but only when each tile still has >= 256 rows.
    """
    budget = _vmem_budget_bytes()
    avail = max(budget - resident_weight_bytes, 0)
    tb_max = avail // max(bytes_per_row, 1)
    tb_max = max(row_mult, (tb_max // row_mult) * row_mult)
    tb = min(tb_max, 2048, _round_up(B, row_mult))
    if num_cores > 1:
        per_core = _round_up((B + num_cores - 1) // num_cores, row_mult)
        if per_core >= 256:
            tb = min(tb, per_core)
    return max(tb, row_mult)


# --------------------------------------------------------------------------------------
# kernels
# --------------------------------------------------------------------------------------
def _encoder_math(x, w1, b1, wh, bh, *, z_dim, approx_gelu):
    # LinearGELU: Linear -> LayerNorm(no affine, eps=1e-5) -> GELU (LN/GELU math in f32)
    h = jnp.dot(x, w1, preferred_element_type=jnp.float32)
    h = h + b1.astype(jnp.float32)
    mean = jnp.mean(h, axis=-1, keepdims=True)
    var = jnp.mean((h - mean) ** 2, axis=-1, keepdims=True)       # biased var (PyTorch LN)
    hn = (h - mean) * jax.lax.rsqrt(var + 1e-5)
    if approx_gelu:
        g = jax.nn.gelu(hn, approximate=True)                     # tanh -> EUP (fast path)
    else:
        g = 0.5 * hn * (1.0 + jax.lax.erf(hn / SQRT_2))           # nn.GELU() exact (default)

    # fused heads: one matmul produces [mu | logvar]
    head = jnp.dot(g.astype(wh.dtype), wh, preferred_element_type=jnp.float32)
    head = head + bh.astype(jnp.float32)
    mu = head[:, :z_dim]
    scale = jax.nn.softplus(head[:, z_dim:])                      # Softplus(beta=1)
    return mu, scale


def _pack_out(z, mu, scale, out_ref):
    # single lane-dense output slab: [ z | mu | scale | zero-pad to a 128-lane multiple ]
    tb, zd = z.shape
    pieces = [z, mu, scale]
    pad = out_ref.shape[-1] - 3 * zd
    if pad:
        pieces.append(jnp.zeros((tb, pad), jnp.float32))
    out_ref[...] = jnp.concatenate(pieces, axis=-1).astype(out_ref.dtype)


def encoder_kernel(x_ref, w1_ref, b1_ref, wh_ref, bh_ref, eps_ref, out_ref, *,
                   z_dim, approx_gelu):
    mu, scale = _encoder_math(x_ref[...], w1_ref[...], b1_ref[...], wh_ref[...], bh_ref[...],
                              z_dim=z_dim, approx_gelu=approx_gelu)
    z = mu + scale * eps_ref[...].astype(jnp.float32)
    _pack_out(z, mu, scale, out_ref)


def encoder_kernel_rng(seed_ref, x_ref, w1_ref, b1_ref, wh_ref, bh_ref, out_ref, *,
                       z_dim, approx_gelu):
    # reparameterization noise drawn on-chip (no eps HBM stream)
    mu, scale = _encoder_math(x_ref[...], w1_ref[...], b1_ref[...], wh_ref[...], bh_ref[...],
                              z_dim=z_dim, approx_gelu=approx_gelu)
    pltpu.prng_seed(seed_ref[0] + pl.program_id(0))
    eps = pltpu.stateful_normal(mu.shape, jnp.float32)
    z = mu + scale * eps
    _pack_out(z, mu, scale, out_ref)


# --------------------------------------------------------------------------------------
# wrapper
# --------------------------------------------------------------------------------------
def fuse_head_params(params):
    """Fuse the mu / logvar heads ONCE at init (hoisted out of the per-call path)."""
    w1, b1, wmu, bmu, wlv, blv = params
    wh = jnp.concatenate([wmu, wlv], axis=1)        # [h_dim, 2*z_dim]
    bh = jnp.concatenate([bmu, blv], axis=1)        # [1, 2*z_dim]
    return w1, b1, wh, bh


def encoder_forward(x, fused_params, eps=None, *, seed=0, tb=None, compute_dtype=None,
                    approx_gelu=False, sample_in_kernel=False, single_buffer_weights=True):
    """x: [B, x_dim]; fused_params = fuse_head_params(params).

    eps: [B, z_dim] standard-normal noise (required unless sample_in_kernel=True).
    compute_dtype: e.g. jnp.bfloat16 to halve x/W HBM traffic and double MXU rate
    (LN/GELU/softplus math stays f32).  Default f32 for exact parity with PyTorch.
    """
    B, x_dim = x.shape
    w1, b1, wh, bh = fused_params
    h_dim = w1.shape[1]
    z_dim = wh.shape[1] // 2
    out_pad = _round_up(3 * z_dim, _LANE)           # lane-dense output slab

    if compute_dtype is not None:
        x = x.astype(compute_dtype)
        w1 = w1.astype(compute_dtype)
        wh = wh.astype(compute_dtype)

    x_itemsize = x.dtype.itemsize
    w_itemsize = w1.dtype.itemsize
    row_mult = 16 if x_itemsize == 2 else 8         # bf16 vregs pack (16,128)

    use_eps = not sample_in_kernel
    if use_eps and eps is None:
        raise ValueError("eps is required unless sample_in_kernel=True")

    # resident / per-row VMEM bytes (biases always f32)
    weight_bytes = ((x_dim * h_dim + h_dim * 2 * z_dim) * w_itemsize
                    + (h_dim + 2 * z_dim) * 4)
    wbuf = 1 if single_buffer_weights else 2
    bytes_per_row = 2 * (x_dim * x_itemsize          # x tile (double-buffered)
                         + (z_dim * 4 if use_eps else 0)
                         + out_pad * 4)              # out tile (double-buffered)

    num_cores = _num_tensorcores()
    if tb is None:
        tb = _pick_tb(B, bytes_per_row=bytes_per_row,
                      resident_weight_bytes=weight_bytes * wbuf,
                      row_mult=row_mult, num_cores=num_cores)
    tb = _round_up(tb, row_mult)
    B_pad = _round_up(B, tb)
    if B_pad != B:
        x = jnp.pad(x, ((0, B_pad - B), (0, 0)))
        if use_eps:
            eps = jnp.pad(eps, ((0, B_pad - B), (0, 0)))
    grid = (B_pad // tb,)

    # advisory cost estimate (erf is a VALU polynomial, folded into flops; softplus ~ 2/elem)
    flops = 2 * B_pad * (x_dim * h_dim + h_dim * 2 * z_dim)
    transcendentals = 2 * B_pad * z_dim + (B_pad * h_dim if approx_gelu else 0)
    bytes_accessed = (B_pad * x_dim * x_itemsize + weight_bytes
                      + (B_pad * z_dim * 4 if use_eps else 0) + B_pad * out_pad * 4)
    cost = pl.CostEstimate(flops=flops, transcendentals=transcendentals,
                           bytes_accessed=bytes_accessed)

    # explicit VMEM limit from actual buffer sizes (don't rely on the default scoped limit)
    usage = weight_bytes * wbuf + bytes_per_row * tb
    vmem_limit = int(min(64 << 20, max(32 << 20, 2 * usage + (4 << 20))))

    def _call(weight_pipeline_mode):
        tile = lambda i, *_: (i, 0)
        const = lambda i, *_: (0, 0)
        wkw = {"pipeline_mode": weight_pipeline_mode} if weight_pipeline_mode is not None else {}
        # TODO(synk): for very large h_dim (weights > ~1/4 of v7x VMEM) add a grid axis over
        # h_dim with an f32 accumulator instead of loading W1 as one block.
        in_specs = [
            pl.BlockSpec((tb, x_dim), tile),                     # x tile
            pl.BlockSpec((x_dim, h_dim), const, **wkw),          # W1   (constant index -> single buffer)
            pl.BlockSpec((1, h_dim), const, **wkw),              # b1
            pl.BlockSpec((h_dim, 2 * z_dim), const, **wkw),      # [Wmu | Wlv]
            pl.BlockSpec((1, 2 * z_dim), const, **wkw),          # [bmu | blv]
        ]
        if use_eps:
            kern = functools.partial(encoder_kernel, z_dim=z_dim, approx_gelu=approx_gelu)
            nsp = 0
            operands = (x, w1, b1, wh, bh, eps)
            in_specs.append(pl.BlockSpec((tb, z_dim), tile))     # eps tile
        else:
            kern = functools.partial(encoder_kernel_rng, z_dim=z_dim, approx_gelu=approx_gelu)
            nsp = 1
            operands = (jnp.asarray([seed], jnp.int32), x, w1, b1, wh, bh)
        return pl.pallas_call(
            kern,
            out_shape=jax.ShapeDtypeStruct((B_pad, out_pad), jnp.float32),
            grid_spec=pltpu.PrefetchScalarGridSpec(
                num_scalar_prefetch=nsp, grid=grid,
                in_specs=in_specs,
                out_specs=pl.BlockSpec((tb, out_pad), tile)),    # lane-dense output slab
            compiler_params=pltpu.CompilerParams(
                dimension_semantics=("parallel",),
                vmem_limit_bytes=vmem_limit),
            cost_estimate=cost,
        )(*operands)

    if single_buffer_weights:
        try:
            out = _call(pl.Buffered(1))
            out.block_until_ready()
        except Exception:
            out = _call(None)   # fall back to default double-buffered weight specs
    else:
        out = _call(None)

    z = out[:B, :z_dim]
    mu = out[:B, z_dim:2 * z_dim]
    scale = out[:B, 2 * z_dim:3 * z_dim]
    # qz = Normal(mu, scale); z is its rsample
    return z, (mu, scale)


def init_params(key, x_dim, h_dim, z_dim):
    """Deterministic synthetic parameters (Kaiming-uniform-ish, like nn.Linear defaults)."""
    ks = jax.random.split(key, 6)

    def lin(kw, kb, fan_in, fan_out):
        bound = 1.0 / jnp.sqrt(fan_in)
        w = jax.random.uniform(kw, (fan_in, fan_out), jnp.float32, -bound, bound)
        b = jax.random.uniform(kb, (1, fan_out), jnp.float32, -bound, bound)
        return w, b

    w1, b1 = lin(ks[0], ks[1], x_dim, h_dim)
    wmu, bmu = lin(ks[2], ks[3], h_dim, z_dim)
    wlv, blv = lin(ks[4], ks[5], h_dim, z_dim)
    return (w1, b1, wmu, bmu, wlv, blv)


if __name__ == "__main__":
    x_dim, h_dim, z_dim = 32, 64, 16
    B = 16

    key = jax.random.PRNGKey(0)
    k_x, k_p, k_e = jax.random.split(key, 3)

    x = jax.random.normal(k_x, (B, x_dim), jnp.float32)
    params = init_params(k_p, x_dim, h_dim, z_dim)
    fused = fuse_head_params(params)        # head fusion hoisted out of the per-call path
    eps = jax.random.normal(k_e, (B, z_dim), jnp.float32)   # rsample noise (deterministic)

    z, (mu, scale) = encoder_forward(x, fused, eps)
    jax.block_until_ready((z, mu, scale))

    # parity check against pure-JAX reference (exact-erf GELU, streamed-eps path)
    w1, b1, wmu, bmu, wlv, blv = params
    h = x @ w1 + b1
    h = (h - h.mean(-1, keepdims=True)) * jax.lax.rsqrt(h.var(-1, keepdims=True) + 1e-5)
    g = 0.5 * h * (1.0 + jax.lax.erf(h / SQRT_2))
    mu_ref = g @ wmu + bmu
    sc_ref = jax.nn.softplus(g @ wlv + blv)
    z_ref = mu_ref + sc_ref * eps
    assert jnp.allclose(z, z_ref, atol=1e-5, rtol=1e-5)
    assert jnp.allclose(mu, mu_ref, atol=1e-5, rtol=1e-5)
    assert jnp.allclose(scale, sc_ref, atol=1e-5, rtol=1e-5)

    # Optional fast path (in-kernel PRNG noise + tanh-GELU): performance variant only,
    # not bit-exact vs the host-side noise, so just sanity-check it if available.
    try:
        z2, (mu2, sc2) = encoder_forward(x, fused, None, seed=123,
                                         sample_in_kernel=True, approx_gelu=True)
        jax.block_until_ready((z2, mu2, sc2))
        assert z2.shape == (B, z_dim) and bool(jnp.all(jnp.isfinite(z2)))
        assert jnp.allclose(mu2, mu_ref, atol=2e-2, rtol=2e-2)   # tanh-GELU ~= erf-GELU
    except Exception:
        pass  # fast path is optional; the parity path above is the source of truth

    print("KERNEL_OK")
</pallas_src>

<mosaic_0001>
module attributes {stable_mosaic.version = 11 : i64} {
  func.func @encoder_kernel(%arg0: i32, %arg1: memref<16x32xf32, #tpu.memory_space<vmem>>, %arg2: memref<32x64xf32, #tpu.memory_space<vmem>>, %arg3: memref<1x64xf32, #tpu.memory_space<vmem>>, %arg4: memref<64x32xf32, #tpu.memory_space<vmem>>, %arg5: memref<1x32xf32, #tpu.memory_space<vmem>>, %arg6: memref<16x16xf32, #tpu.memory_space<vmem>>, %arg7: memref<16x128xf32, #tpu.memory_space<vmem>>) attributes {dimension_semantics = [#tpu.dimension_semantics<parallel>], iteration_bounds = array<i64: 1>, scalar_prefetch = 0 : i64, scratch_operands = 0 : i64, tpu.core_type = #tpu.core_type<tc>, window_params = [{transform_indices = @transform_0, window_bounds = array<i64: 16, 32>}, {pipeline_mode = #tpu.pipeline_mode<synchronous>, transform_indices = @transform_1, window_bounds = array<i64: 32, 64>}, {pipeline_mode = #tpu.pipeline_mode<synchronous>, transform_indices = @transform_2, window_bounds = array<i64: 1, 64>}, {pipeline_mode = #tpu.pipeline_mode<synchronous>, transform_indices = @transform_3, window_bounds = array<i64: 64, 32>}, {pipeline_mode = #tpu.pipeline_mode<synchronous>, transform_indices = @transform_4, window_bounds = array<i64: 1, 32>}, {transform_indices = @transform_5, window_bounds = array<i64: 16, 16>}, {transform_indices = @transform_6, window_bounds = array<i64: 16, 128>}]} {
    %c0 = arith.constant 0 : index
    %c0_0 = arith.constant 0 : index
    %0 = vector.load %arg1[%c0, %c0_0] : memref<16x32xf32, #tpu.memory_space<vmem>>, vector<16x32xf32>
    %c0_1 = arith.constant 0 : index
    %c0_2 = arith.constant 0 : index
    %1 = vector.load %arg2[%c0_1, %c0_2] : memref<32x64xf32, #tpu.memory_space<vmem>>, vector<32x64xf32>
    %c0_3 = arith.constant 0 : index
    %c0_4 = arith.constant 0 : index
    %2 = vector.load %arg3[%c0_3, %c0_4] : memref<1x64xf32, #tpu.memory_space<vmem>>, vector<1x64xf32>
    %c0_5 = arith.constant 0 : index
    %c0_6 = arith.constant 0 : index
    %3 = vector.load %arg4[%c0_5, %c0_6] : memref<64x32xf32, #tpu.memory_space<vmem>>, vector<64x32xf32>
    %c0_7 = arith.constant 0 : index
    %c0_8 = arith.constant 0 : index
    %4 = vector.load %arg5[%c0_7, %c0_8] : memref<1x32xf32, #tpu.memory_space<vmem>>, vector<1x32xf32>
    %cst = arith.constant dense<0.000000e+00> : vector<16x64xf32>
    %5 = tpu.matmul %0, %1, %cst {dimension_numbers = #tpu.dot_dimension_numbers<[1], [0], [0], [1], [0, 0, 1, 1], [], []>} : vector<16x32xf32>, vector<32x64xf32>, vector<16x64xf32> -> vector<16x64xf32>
    %6 = vector.broadcast %2 : vector<1x64xf32> to vector<16x64xf32>
    %7 = arith.addf %5, %6 : vector<16x64xf32>
    %cst_9 = arith.constant dense<0.000000e+00> : vector<16xf32>
    %8 = vector.multi_reduction <add>, %7, %cst_9 [1] : vector<16x64xf32> to vector<16xf32>
    %9 = vector.shape_cast %8 : vector<16xf32> to vector<16x1xf32>
    %cst_10 = arith.constant 6.400000e+01 : f32
    %10 = vector.broadcast %cst_10 : f32 to vector<16x1xf32>
    %11 = arith.divf %9, %10 : vector<16x1xf32>
    %12 = vector.broadcast %11 : vector<16x1xf32> to vector<16x64xf32>
    %13 = arith.subf %7, %12 : vector<16x64xf32>
    %14 = arith.mulf %13, %13 : vector<16x64xf32>
    %cst_11 = arith.constant dense<0.000000e+00> : vector<16xf32>
    %15 = vector.multi_reduction <add>, %14, %cst_11 [1] : vector<16x64xf32> to vector<16xf32>
    %16 = vector.shape_cast %15 : vector<16xf32> to vector<16x1xf32>
    %cst_12 = arith.constant 6.400000e+01 : f32
    %17 = vector.broadcast %cst_12 : f32 to vector<16x1xf32>
    %18 = arith.divf %16, %17 : vector<16x1xf32>
    %19 = vector.broadcast %11 : vector<16x1xf32> to vector<16x64xf32>
    %20 = arith.subf %7, %19 : vector<16x64xf32>
    %cst_13 = arith.constant 9.99999974E-6 : f32
    %21 = vector.broadcast %cst_13 : f32 to vector<16x1xf32>
    %22 = arith.addf %18, %21 : vector<16x1xf32>
    %23 = math.rsqrt %22 : vector<16x1xf32>
    %24 = vector.broadcast %23 : vector<16x1xf32> to vector<16x64xf32>
    %25 = arith.mulf %20, %24 : vector<16x64xf32>
    %cst_14 = arith.constant 5.000000e-01 : f32
    %26 = vector.broadcast %cst_14 : f32 to vector<16x64xf32>
    %27 = arith.mulf %26, %25 : vector<16x64xf32>
    %cst_15 = arith.constant 1.41421354 : f32
    %28 = vector.broadcast %cst_15 : f32 to vector<16x64xf32>
    %29 = arith.divf %25, %28 : vector<16x64xf32>
    %30 = math.erf %29 : vector<16x64xf32>
    %cst_16 = arith.constant 1.000000e+00 : f32
    %31 = vector.broadcast %cst_16 : f32 to vector<16x64xf32>
    %32 = arith.addf %31, %30 : vector<16x64xf32>
    %33 = arith.mulf %27, %32 : vector<16x64xf32>
    %cst_17 = arith.constant dense<0.000000e+00> : vector<16x32xf32>
    %34 = tpu.matmul %33, %3, %cst_17 {dimension_numbers = #tpu.dot_dimension_numbers<[1], [0], [0], [1], [0, 0, 1, 1], [], []>} : vector<16x64xf32>, vector<64x32xf32>, vector<16x32xf32> -> vector<16x32xf32>
    %35 = vector.broadcast %4 : vector<1x32xf32> to vector<16x32xf32>
    %36 = arith.addf %34, %35 : vector<16x32xf32>
    %37 = vector.extract_strided_slice %36 {offsets = [0, 0], sizes = [16, 16], strides = [1, 1]} : vector<16x32xf32> to vector<16x16xf32>
    %38 = vector.extract_strided_slice %36 {offsets = [0, 16], sizes = [16, 16], strides = [1, 1]} : vector<16x32xf32> to vector<16x16xf32>
    %cst_18 = arith.constant 0.000000e+00 : f32
    %39 = vector.broadcast %cst_18 : f32 to vector<16x16xf32>
    %40 = arith.maximumf %38, %39 : vector<16x16xf32>
    %41 = vector.broadcast %cst_18 : f32 to vector<16x16xf32>
    %42 = arith.subf %38, %41 : vector<16x16xf32>
    %43 = arith.cmpf one, %42, %42 : vector<16x16xf32>
    %44 = vector.broadcast %cst_18 : f32 to vector<16x16xf32>
    %45 = arith.addf %38, %44 : vector<16x16xf32>
    %46 = math.absf %42 : vector<16x16xf32>
    %cst_19 = arith.constant 0.000000e+00 : f32
    %47 = vector.broadcast %cst_19 : f32 to vector<16x16xf32>
    %48 = arith.subf %47, %46 : vector<16x16xf32>
    %49 = math.exp %48 : vector<16x16xf32>
    %50 = math.log1p %49 : vector<16x16xf32>
    %51 = arith.addf %40, %50 : vector<16x16xf32>
    %52 = arith.select %43, %45, %51 : vector<16x16xi1>, vector<16x16xf32>
    %c0_20 = arith.constant 0 : index
    %c0_21 = arith.constant 0 : index
    %53 = vector.load %arg6[%c0_20, %c0_21] : memref<16x16xf32, #tpu.memory_space<vmem>>, vector<16x16xf32>
    %54 = arith.mulf %52, %53 : vector<16x16xf32>
    %55 = arith.addf %37, %54 : vector<16x16xf32>
    %cst_22 = arith.constant 0.000000e+00 : f32
    %56 = vector.broadcast %cst_22 : f32 to vector<16x80xf32>
    %57 = tpu.concatenate %55, %37, %52, %56 in 1 : vector<16x16xf32>, vector<16x16xf32>, vector<16x16xf32>, vector<16x80xf32> -> vector<16x128xf32>
    %c0_23 = arith.constant 0 : index
    %c0_24 = arith.constant 0 : index
    %58 = vector.load %arg7[%c0_23, %c0_24] : memref<16x128xf32, #tpu.memory_space<vmem>>, vector<16x128xf32>
    tpu.vector_store %arg7[%c0_23, %c0_24], %57 {strides = array<i32>} : memref<16x128xf32, #tpu.memory_space<vmem>>, vector<16x128xf32>,
    return
  }
  func.func @transform_0(%arg0: i32) -> (i32, i32) {
    %c0_i32 = arith.constant 0 : i32
    %c0_i32_0 = arith.constant 0 : i32
    return %arg0, %c0_i32 : i32, i32
  }
  func.func @transform_1(%arg0: i32) -> (i32, i32) {
    %c0_i32 = arith.constant 0 : i32
    %c0_i32_0 = arith.constant 0 : i32
    %c0_i32_1 = arith.constant 0 : i32
    return %c0_i32, %c0_i32_0 : i32, i32
  }
  func.func @transform_2(%arg0: i32) -> (i32, i32) {
    %c0_i32 = arith.constant 0 : i32
    %c0_i32_0 = arith.constant 0 : i32
    %c0_i32_1 = arith.constant 0 : i32
    return %c0_i32, %c0_i32_0 : i32, i32
  }
  func.func @transform_3(%arg0: i32) -> (i32, i32) {
    %c0_i32 = arith.constant 0 : i32
    %c0_i32_0 = arith.constant 0 : i32
    %c0_i32_1 = arith.constant 0 : i32
    return %c0_i32, %c0_i32_0 : i32, i32
  }
  func.func @transform_4(%arg0: i32) -> (i32, i32) {
    %c0_i32 = arith.constant 0 : i32
    %c0_i32_0 = arith.constant 0 : i32
    %c0_i32_1 = arith.constant 0 : i32
    return %c0_i32, %c0_i32_0 : i32, i32
  }
  func.func @transform_5(%arg0: i32) -> (i32, i32) {
    %c0_i32 = arith.constant 0 : i32
    %c0_i32_0 = arith.constant 0 : i32
    return %arg0, %c0_i32 : i32, i32
  }
  func.func @transform_6(%arg0: i32) -> (i32, i32) {
    %c0_i32 = arith.constant 0 : i32
    %c0_i32_0 = arith.constant 0 : i32
    return %arg0, %c0_i32 : i32, i32
  }
}

module attributes {stable_mosaic.version = 11 : i64} {
  func.func @encoder_kernel(%arg0: i32, %arg1: memref<16x32xf32, #tpu.memory_space<vmem>>, %arg2: memref<32x64xf32, #tpu.memory_space<vmem>>, %arg3: memref<1x64xf32, #tpu.memory_space<vmem>>, %arg4: memref<64x32xf32, #tpu.memory_space<vmem>>, %arg5: memref<1x32xf32, #tpu.memory_space<vmem>>, %arg6: memref<16x16xf32, #tpu.memory_space<vmem>>, %arg7: memref<16x128xf32, #tpu.memory_space<vmem>>) attributes {dimension_semantics = [#tpu.dimension_semantics<parallel>], iteration_bounds = array<i64: 1>, scalar_prefetch = 0 : i64, scratch_operands = 0 : i64, tpu.core_type = #tpu.core_type<tc>, window_params = [{transform_indices = @transform_0, window_bounds = array<i64: 16, 32>}, {pipeline_mode = #tpu.pipeline_mode<synchronous>, transform_indices = @transform_1, window_bounds = array<i64: 32, 64>}, {pipeline_mode = #tpu.pipeline_mode<synchronous>, transform_indices = @transform_2, window_bounds = array<i64: 1, 64>}, {pipeline_mode = #tpu.pipeline_mode<synchronous>, transform_indices = @transform_3, window_bounds = array<i64: 64, 32>}, {pipeline_mode = #tpu.pipeline_mode<synchronous>, transform_indices = @transform_4, window_bounds = array<i64: 1, 32>}, {transform_indices = @transform_5, window_bounds = array<i64: 16, 16>}, {transform_indices = @transform_6, window_bounds = array<i64: 16, 128>}]} {
    %c0 = arith.constant 0 : index
    %c0_0 = arith.constant 0 : index
    %0 = vector.load %arg1[%c0, %c0_0] : memref<16x32xf32, #tpu.memory_space<vmem>>, vector<16x32xf32>
    %c0_1 = arith.constant 0 : index
    %c0_2 = arith.constant 0 : index
    %1 = vector.load %arg2[%c0_1, %c0_2] : memref<32x64xf32, #tpu.memory_space<vmem>>, vector<32x64xf32>
    %c0_3 = arith.constant 0 : index
    %c0_4 = arith.constant 0 : index
    %2 = vector.load %arg3[%c0_3, %c0_4] : memref<1x64xf32, #tpu.memory_space<vmem>>, vector<1x64xf32>
    %c0_5 = arith.constant 0 : index
    %c0_6 = arith.constant 0 : index
    %3 = vector.load %arg4[%c0_5, %c0_6] : memref<64x32xf32, #tpu.memory_space<vmem>>, vector<64x32xf32>
    %c0_7 = arith.constant 0 : index
    %c0_8 = arith.constant 0 : index
    %4 = vector.load %arg5[%c0_7, %c0_8] : memref<1x32xf32, #tpu.memory_space<vmem>>, vector<1x32xf32>
    %cst = arith.constant dense<0.000000e+00> : vector<16x64xf32>
    %5 = tpu.matmul %0, %1, %cst {dimension_numbers = #tpu.dot_dimension_numbers<[1], [0], [0], [1], [0, 0, 1, 1], [], []>} : vector<16x32xf32>, vector<32x64xf32>, vector<16x64xf32> -> vector<16x64xf32>
    %6 = vector.broadcast %2 : vector<1x64xf32> to vector<16x64xf32>
    %7 = arith.addf %5, %6 : vector<16x64xf32>
    %cst_9 = arith.constant dense<0.000000e+00> : vector<16xf32>
    %8 = vector.multi_reduction <add>, %7, %cst_9 [1] : vector<16x64xf32> to vector<16xf32>
    %9 = vector.shape_cast %8 : vector<16xf32> to vector<16x1xf32>
    %cst_10 = arith.constant 6.400000e+01 : f32
    %10 = vector.broadcast %cst_10 : f32 to vector<16x1xf32>
    %11 = arith.divf %9, %10 : vector<16x1xf32>
    %12 = vector.broadcast %11 : vector<16x1xf32> to vector<16x64xf32>
    %13 = arith.subf %7, %12 : vector<16x64xf32>
    %14 = arith.mulf %13, %13 : vector<16x64xf32>
    %cst_11 = arith.constant dense<0.000000e+00> : vector<16xf32>
    %15 = vector.multi_reduction <add>, %14, %cst_11 [1] : vector<16x64xf32> to vector<16xf32>
    %16 = vector.shape_cast %15 : vector<16xf32> to vector<16x1xf32>
    %cst_12 = arith.constant 6.400000e+01 : f32
    %17 = vector.broadcast %cst_12 : f32 to vector<16x1xf32>
    %18 = arith.divf %16, %17 : vector<16x1xf32>
    %19 = vector.broadcast %11 : vector<16x1xf32> to vector<16x64xf32>
    %20 = arith.subf %7, %19 : vector<16x64xf32>
    %cst_13 = arith.constant 9.99999974E-6 : f32
    %21 = vector.broadcast %cst_13 : f32 to vector<16x1xf32>
    %22 = arith.addf %18, %21 : vector<16x1xf32>
    %23 = math.rsqrt %22 : vector<16x1xf32>
    %24 = vector.broadcast %23 : vector<16x1xf32> to vector<16x64xf32>
    %25 = arith.mulf %20, %24 : vector<16x64xf32>
    %cst_14 = arith.constant 5.000000e-01 : f32
    %26 = vector.broadcast %cst_14 : f32 to vector<16x64xf32>
    %27 = arith.mulf %26, %25 : vector<16x64xf32>
    %cst_15 = arith.constant 1.41421354 : f32
    %28 = vector.broadcast %cst_15 : f32 to vector<16x64xf32>
    %29 = arith.divf %25, %28 : vector<16x64xf32>
    %30 = math.erf %29 : vector<16x64xf32>
    %cst_16 = arith.constant 1.000000e+00 : f32
    %31 = vector.broadcast %cst_16 : f32 to vector<16x64xf32>
    %32 = arith.addf %31, %30 : vector<16x64xf32>
    %33 = arith.mulf %27, %32 : vector<16x64xf32>
    %cst_17 = arith.constant dense<0.000000e+00> : vector<16x32xf32>
    %34 = tpu.matmul %33, %3, %cst_17 {dimension_numbers = #tpu.dot_dimension_numbers<[1], [0], [0], [1], [0, 0, 1, 1], [], []>} : vector<16x64xf32>, vector<64x32xf32>, vector<16x32xf32> -> vector<16x32xf32>
    %35 = vector.broadcast %4 : vector<1x32xf32> to vector<16x32xf32>
    %36 = arith.addf %34, %35 : vector<16x32xf32>
    %37 = vector.extract_strided_slice %36 {offsets = [0, 0], sizes = [16, 16], strides = [1, 1]} : vector<16x32xf32> to vector<16x16xf32>
    %38 = vector.extract_strided_slice %36 {offsets = [0, 16], sizes = [16, 16], strides = [1, 1]} : vector<16x32xf32> to vector<16x16xf32>
    %cst_18 = arith.constant 0.000000e+00 : f32
    %39 = vector.broadcast %cst_18 : f32 to vector<16x16xf32>
    %40 = arith.maximumf %38, %39 : vector<16x16xf32>
    %41 = vector.broadcast %cst_18 : f32 to vector<16x16xf32>
    %42 = arith.subf %38, %41 : vector<16x16xf32>
    %43 = arith.cmpf one, %42, %42 : vector<16x16xf32>
    %44 = vector.broadcast %cst_18 : f32 to vector<16x16xf32>
    %45 = arith.addf %38, %44 : vector<16x16xf32>
    %46 = math.absf %42 : vector<16x16xf32>
    %cst_19 = arith.constant 0.000000e+00 : f32
    %47 = vector.broadcast %cst_19 : f32 to vector<16x16xf32>
    %48 = arith.subf %47, %46 : vector<16x16xf32>
    %49 = math.exp %48 : vector<16x16xf32>
    %50 = math.log1p %49 : vector<16x16xf32>
    %51 = arith.addf %40, %50 : vector<16x16xf32>
    %52 = arith.select %43, %45, %51 : vector<16x16xi1>, vector<16x16xf32>
    %c0_20 = arith.constant 0 : index
    %c0_21 = arith.constant 0 : index
    %53 = vector.load %arg6[%c0_20, %c0_21] : memref<16x16xf32, #tpu.memory_space<vmem>>, vector<16x16xf32>
    %54 = arith.mulf %52, %53 : vector<16x16xf32>
    %55 = arith.addf %37, %54 : vector<16x16xf32>
    %cst_22 = arith.constant 0.000000e+00 : f32
    %56 = vector.broadcast %cst_22 : f32 to vector<16x80xf32>
    %57 = tpu.concatenate %55, %37, %52, %56 in 1 : vector<16x16xf32>, vector<16x16xf32>, vector<16x16xf32>, vector<16x80xf32> -> vector<16x128xf32>
    %c0_23 = arith.constant 0 : index
    %c0_24 = arith.constant 0 : index
    %58 = vector.load %arg7[%c0_23, %c0_24] : memref<16x128xf32, #tpu.memory_space<vmem>>, vector<16x128xf32>
    tpu.vector_store %arg7[%c0_23, %c0_24], %57 {strides = array<i32>} : memref<16x128xf32, #tpu.memory_space<vmem>>, vector<16x128xf32>,
    return
  }
  func.func @transform_0(%arg0: i32) -> (i32, i32) {
    %c0_i32 = arith.constant 0 : i32
    %c0_i32_0 = arith.constant 0 : i32
    return %arg0, %c0_i32 : i32, i32
  }
  func.func @transform_1(%arg0: i32) -> (i32, i32) {
    %c0_i32 = arith.constant 0 : i32
    %c0_i32_0 = arith.constant 0 : i32
    %c0_i32_1 = arith.constant 0 : i32
    return %c0_i32, %c0_i32_0 : i32, i32
  }
  func.func @transform_2(%arg0: i32) -> (i32, i32) {
    %c0_i32 = arith.constant 0 : i32
    %c0_i32_0 = arith.constant 0 : i32
    %c0_i32_1 = arith.constant 0 : i32
    return %c0_i32, %c0_i32_0 : i32, i32
  }
  func.func @transform_3(%arg0: i32) -> (i32, i32) {
    %c0_i32 = arith.constant 0 : i32
    %c0_i32_0 = arith.constant 0 : i32
    %c0_i32_1 = arith.constant 0 : i32
    return %c0_i32, %c0_i32_0 : i32, i32
  }
  func.func @transform_4(%arg0: i32) -> (i32, i32) {
    %c0_i32 = arith.constant 0 : i32
    %c0_i32_0 = arith.constant 0 : i32
    %c0_i32_1 = arith.constant 0 : i32
    return %c0_i32, %c0_i32_0 : i32, i32
  }
  func.func @transform_5(%arg0: i32) -> (i32, i32) {
    %c0_i32 = arith.constant 0 : i32
    %c0_i32_0 = arith.constant 0 : i32
    return %arg0, %c0_i32 : i32, i32
  }
  func.func @transform_6(%arg0: i32) -> (i32, i32) {
    %c0_i32 = arith.constant 0 : i32
    %c0_i32_0 = arith.constant 0 : i32
    return %arg0, %c0_i32 : i32, i32
  }
}

</mosaic_0001>

<bundles_post_ra>
// kernel: tpu_custom_call.1
= control target key start
LH: loop header
LB: loop body
LE: loop exit
PB: predicated region body
PF: predicated region fallthrough
CT: control target
= control target key end

     0   :  { %vm46_vm0 = vcmask 261120   ;;  %s597_s0 = inlined_call_operand.vmem [shape: f32[16,32], index: 0, kind: input, shape index: {}]   ;;  %s598_s1 = inlined_call_operand.vmem [shape: f32[32,64], index: 1, kind: input, shape index: {}]   ;;  %s599_s2 = inlined_call_operand.vmem [shape: f32[1,64], index: 2, kind: input, shape index: {}]   ;;  %s600_s3 = inlined_call_operand.vmem [shape: f32[64,32], index: 3, kind: input, shape index: {}]   ;;  %s601_s4 = inlined_call_operand.vmem [shape: f32[1,32], index: 4, kind: input, shape index: {}]   ;;  %s602_s5 = inlined_call_operand.vmem [shape: f32[16,16], index: 5, kind: input, shape index: {}]   ;;  %s603_s6 = inlined_call_operand.hbm [shape: f32[16,128], index: 6, kind: output, shape index: {}]  }
   0x1   :  { %v26_v0 = vld [vmem:[%s598_s1] sm:$0xff]  ;;  %v27_v1 = vld [vmem:[%s598_s1 + $0x8] sm:$0xff]  ;;  %v28_v2 = vld [vmem:[%s598_s1 + $0x10] sm:$0xff] }
   0x2   :  { %v406_v3 = vpack.c.bf16 %v27_v1, %v26_v0  ;;  %v29_v4 = vld [vmem:[%s598_s1 + $0x18] sm:$0xff]  ;;  %v24_v5 = vld [vmem:[%s597_s0] sm:$0xff] }
   0x3   :  { %v410_v6 = vpack.c.bf16 %v29_v4, %v28_v2  ;;  %384 = vmatprep.mubr.msk.f32.mxu0 %vm46_vm0, %v24_v5 }
   0x4   :  { %11 = vsyncpa [#allocation3], 0  ;;  %407 = vmatprep.subr.bf16.mxu0 %v406_v3  ;;  %v25_v7 = vld [vmem:[%s597_s0 + $0x8] sm:$0xff]  ;;  %v354_v8 = vld [vmem:[%s599_s2] ss:$0 sm:$0xff]  ;;  %vm128_vm1 = vcmask 523264  }
   0x5   :  { %409 = vmatpush3.bf16.msra.mxu0 %v406_v3  ;;  %v31_v25 = vld [vmem:[%s600_s3] sm:$0xff]  ;;  %v32_v26 = vld [vmem:[%s600_s3 + $0x8] sm:$0xff]  ;;  %v33_v27 = vld [vmem:[%s600_s3 + $0x10] sm:$0xff]  ;;  %s475_s28 = smov 16   ;;  %vm328_vm6 = vcmask 130048   ;;  %s477_s29 = smov [#allocation2]  }
   0x6   :  { %411 = vmatprep.subr.bf16.mxu0 %v410_v6  ;;  %v414_v28 = vpack.c.bf16 %v32_v26, %v31_v25  ;;  %v34_v29 = vld [vmem:[%s600_s3 + $0x18] sm:$0xff]  ;;  %v35_v31 = vld [vmem:[%s600_s3 + $0x20] sm:$0xff]  ;;  %v36_v32 = vld [vmem:[%s600_s3 + $0x28] sm:$0xff]  ;;  %s343_s30 = sshll.u32 %s477_s29, 4  ;;  %vm333_vm7 = vcmask 392192   ;;  %s344_s30 = int_to_ptr.vmem [resolvable:$true] %s343_s30 }
   0x7   :  { %v418_v30 = vpack.c.bf16 %v34_v29, %v33_v27  ;;  %v422_v33 = vpack.c.bf16 %v36_v32, %v35_v31  ;;  %v37_v34 = vld [vmem:[%s600_s3 + $0x30] sm:$0xff]  ;;  %v38_v35 = vld [vmem:[%s600_s3 + $0x38] sm:$0xff]  ;;  %v291_v37 = vld [vmem:[%s602_s5 + $0x8] sm:$0xff]  ;;  %s451_s7 = scalar_lea.vmem %s344_s30, 256  ;;  %p456_p1 = scmp.lt.s32.totalorder %s344_s30, %s344_s30 }
   0x8   :  { %415 = vmatprep.subr.bf16.mxu1 %v414_v28  ;;  %v426_v36 = vpack.c.bf16 %v38_v35, %v37_v34  ;;  %v290_v38 = vld [vmem:[%s602_s5] sm:$0xff]  ;;  %p452_p0 = scmp.ne.s32.totalorder %s344_s30, %s451_s7  ;;  %p457_p2 = scmp.lt.s32.totalorder %s451_s7, %s451_s7 }
   0x9   :  { %413 = vmatpush3.bf16.msra.mxu0 %v410_v6  ;;  %417 = vmatpush3.bf16.msra.mxu1 %v414_v28  ;;  %v357_v59 = vld [vmem:[%s601_s4] ss:$0 sm:$0xff]  ;;  %s476_s4 = smov 112  }
   0xa   :  { %419 = vmatprep.subr.bf16.mxu1 %v418_v30  ;;  %p458_p3 = por %p457_p2, %p456_p1 }
   0xc   :  { %385 = vmatmul.mubr.msk.f32.vlgmr.msra.gmra.mrb[0].mxu0 %vm46_vm0, %v25_v7  ;;  %p459_p4 = pnand %p458_p3, %p452_p0 }
   0xd   :  { %421 = vmatpush3.bf16.msra.mxu1 %v418_v30 }
   0xe   :  { %423 = vmatprep.subr.bf16.mxu1 %v422_v33 }
  0x11   :  { %425 = vmatpush3.bf16.msra.mxu1 %v422_v33 }
  0x12   :  { %427 = vmatprep.subr.bf16.mxu1 %v426_v36 }
  0x15   :  { %429 = vmatpush3.bf16.msra.mxu1 %v426_v36 }
  0xdf   :  { %v386_v9 = vpop.f32.mrb[0].mxu0 }
  0xe0   :  { %v119_v10 = vpop.f32.mrb[1].mxu0  ;;  %v125_v12 = vadd.f32 %v386_v9, %v354_v8 }
  0xe1   :  { %v120_v11 = vadd.f32 %v354_v8, %v119_v10 }
  0xe2   :  { %v132_v14 = vsel %vm128_vm1, %v125_v12, 0.0 }
  0xe3   :  { %v129_v13 = vsel %vm128_vm1, %v120_v11, 0.0 }
  0xe4   :  { %130 = vadd.xlane.f32.xlu0 %v129_v13 }
  0xe8   :  { %133 = vadd.xlane.f32.xlu0 %v132_v14 }
  0xfe   :  { %294 = vrot.lane.b32.xlu0 %v290_v38, %s475_s28 }
 0x171   :  { %v131_v15 = vpop.xlane.xlu0 %130 }
 0x172   :  { %v136_v16 = vmul.f32 0.015625, %v131_v15 }
 0x174   :  { %v138_v17 = vsub.f32 %v120_v11, %v136_v16 }
 0x175   :  { %v134_v18 = vpop.xlane.xlu0 %133 }
 0x176   :  { %v137_v19 = vmul.f32 0.015625, %v134_v18  ;;  %v140_v20 = vmul.f32 %v138_v17, %v138_v17 }
 0x178   :  { %v139_v21 = vsub.f32 %v125_v12, %v137_v19  ;;  %v142_v22 = vsel %vm128_vm1, %v140_v20, 0.0 }
 0x179   :  { %143 = vadd.xlane.f32.xlu1 %v142_v22  ;;  %v295_v32 = vpop.permute.xlu0 %294 }
 0x17a   :  { %v141_v23 = vmul.f32 %v139_v21, %v139_v21 }
 0x17c   :  { %v145_v24 = vsel %vm128_vm1, %v141_v23, 0.0 }
 0x17d   :  { %146 = vadd.xlane.f32.xlu1 %v145_v24 }
 0x18e   :  { %296 = vrot.lane.b32.xlu1 %v291_v37, %s475_s28 }
 0x206   :  { %v144_v39 = vpop.xlane.xlu1 %143 }
 0x207   :  { %v148_v40 = vmul.f32 0.015625, %v144_v39 }
 0x209   :  { %v150_v41 = vadd.f32 1e-05, %v148_v40 }
 0x20a   :  { %v147_v42 = vpop.xlane.xlu1 %146 }
 0x20b   :  { %435 = vrsqrt.f32 %v150_v41  ;;  %v149_v43 = vmul.f32 0.015625, %v147_v42 }
 0x20d   :  { %v151_v44 = vadd.f32 1e-05, %v149_v43 }
 0x20e   :  { %v297_v26 = vpop.permute.xlu1 %296 }
 0x20f   :  { %437 = vrsqrt.f32 %v151_v44 }
 0x215   :  { %v436_v45 = vpop.eup %435 }
 0x216   :  { %v154_v46 = vmul.f32 %v436_v45, %v138_v17 }
 0x218   :  { %v159_v47 = vmul.f32 0.70710677, %v154_v46  ;;  %v156_v52 = vmul.f32 0.5, %v154_v46 }
 0x219   :  { %v438_v48 = vpop.eup %437 }
 0x21a   :  { %439 = verf.f32 %v159_v47  ;;  %v155_v49 = vmul.f32 %v438_v48, %v139_v21 }
 0x21c   :  { %v160_v50 = vmul.f32 0.70710677, %v155_v49  ;;  %v157_v56 = vmul.f32 0.5, %v155_v49 }
 0x21e   :  { %441 = verf.f32 %v160_v50 }
 0x224   :  { %v440_v51 = vpop.eup %439 }
 0x225   :  { %v163_v53 = vadd.f32 1.0, %v440_v51 }
 0x227   :  { %v165_v54 = vmul.f32 %v163_v53, %v156_v52 }
 0x228   :  { %v442_v55 = vpop.eup %441 }
 0x229   :  { %403 = vmatprep.mubr.msk.f32.mxu1 %vm128_vm1, %v165_v54  ;;  %v164_v57 = vadd.f32 1.0, %v442_v55 }
 0x22b   :  { %v166_v58 = vmul.f32 %v164_v57, %v157_v56 }
 0x22d   :  { %404 = vmatmul.mubr.msk.f32.vlgmr.msra.gmra.mrb[0].mxu1 %vm128_vm1, %v166_v58 }
 0x300   :  { %v405_v60 = vpop.f32.mrb[0].mxu1 }
 0x301   :  { %v251_v61 = vadd.f32 %v405_v60, %v357_v59  ;;  %v245_v62 = vpop.f32.mrb[1].mxu1 }
 0x302   :  { %v246_v63 = vadd.f32 %v357_v59, %v245_v62 }
 0x303   :  { %v261_v0 = vand.u32 2147483647, %v251_v61  ;;  %316 = vrot.lane.b32.xlu1 %v251_v61, %s475_s28  ;;  %v255_v20 = vmax.f32 %v251_v61, 0.0  ;;  %vm257_vm4 = vcmp.ne.f32.partialorder %v251_v61, %v251_v61 }
 0x304   :  { %v260_v1 = vand.u32 2147483647, %v246_v63  ;;  %314 = vrot.lane.b32.xlu0 %v246_v63, %s475_s28  ;;  %v254_v24 = vmax.f32 %v246_v63, 0.0  ;;  %vm256_vm5 = vcmp.ne.f32.partialorder %v246_v63, %v246_v63 }
 0x305   :  { %v263_v2 = vsub.f32 0.0, %v261_v0 }
 0x306   :  { %v262_v3 = vsub.f32 0.0, %v260_v1 }
 0x307   :  { %v266_v4 = vmul.f32 1.442695, %v263_v2 }
 0x308   :  { %v264_v5 = vmul.f32 1.442695, %v262_v3 }
 0x309   :  { %443 = vpow2.f32 %v266_v4 }
 0x30a   :  { %445 = vpow2.f32 %v264_v5 }
 0x313   :  { %v444_v6 = vpop.eup %443 }
 0x314   :  { %v446_v7 = vpop.eup %445  ;;  %v277_v8 = vadd.f32 1.0, %v444_v6  ;;  %v280_v10 = vmul.f32 -0.5, %v444_v6  ;;  %v283_v13 = vand.u32 2147483647, %v444_v6 }
 0x315   :  { %v268_v9 = vadd.f32 1.0, %v446_v7  ;;  %v271_v11 = vmul.f32 -0.5, %v446_v7  ;;  %v274_v15 = vand.u32 2147483647, %v446_v7 }
 0x316   :  { %447 = vlog2.f32 %v277_v8  ;;  %v281_v12 = vadd.f32 1.0, %v280_v10  ;;  %vm284_vm2 = vcmp.lt.f32.partialorder %v283_v13, 0.0004427343 }
 0x317   :  { %449 = vlog2.f32 %v268_v9  ;;  %v272_v14 = vadd.f32 1.0, %v271_v11  ;;  %vm275_vm3 = vcmp.lt.f32.partialorder %v274_v15, 0.0004427343 }
 0x318   :  { %v282_v19 = vmul.f32 %v444_v6, %v281_v12 }
 0x319   :  { %v273_v22 = vmul.f32 %v446_v7, %v272_v14 }
 0x320   :  { %v448_v16 = vpop.eup %447 }
 0x321   :  { %v450_v17 = vpop.eup %449  ;;  %v279_v18 = vmul.f32 0.6931472, %v448_v16 }
 0x322   :  { %v270_v21 = vmul.f32 0.6931472, %v450_v17 }
 0x323   :  { %v285_v23 = vsel %vm284_vm2, %v282_v19, %v279_v18 }
 0x324   :  { %v287_v25 = vadd.f32 %v285_v23, %v255_v20  ;;  %v276_v27 = vsel %vm275_vm3, %v273_v22, %v270_v21 }
 0x325   :  { %v286_v28 = vadd.f32 %v276_v27, %v254_v24 }
 0x326   :  { %v289_v29 = vsel %vm257_vm4, %v251_v61, %v287_v25 }
 0x327   :  { %v301_v30 = vmul.f32 %v297_v26, %v289_v29  ;;  %v288_v31 = vsel %vm256_vm5, %v246_v63, %v286_v28 }
 0x328   :  { %322 = vrot.lane.b32.xlu0 %v288_v31, %s475_s28  ;;  %v300_v33 = vmul.f32 %v295_v32, %v288_v31 }
 0x329   :  { %306 = vrot.lane.b32.xlu1 %v301_v30, %s476_s4 }
 0x32d   :  { %304 = vrot.lane.b32.xlu1 %v300_v33, %s476_s4 }
 0x331   :  { %324 = vrot.lane.b32.xlu1 %v289_v29, %s475_s28 }
 0x375   :  { %v317_v34 = vpop.permute.xlu1 %316 }
 0x376   :  { %v315_v36 = vpop.permute.xlu0 %314 }
 0x39a   :  { %v323_v40 = vpop.permute.xlu0 %322 }
 0x39b   :  { %v307_v35 = vpop.permute.xlu1 %306 }
 0x39c   :  { %v311_v37 = vadd.f32 %v307_v35, %v251_v61 }
 0x39e   :  { %v330_v42 = vsel %vm328_vm6, %v311_v37, %v317_v34 }
 0x39f   :  { %v305_v38 = vpop.permute.xlu1 %304 }
 0x3a0   :  { %v310_v39 = vadd.f32 %v305_v38, %v246_v63 }
 0x3a2   :  { %v329_v41 = vsel %vm328_vm6, %v310_v39, %v315_v36 }
 0x3a3   :  { %v325_v43 = vpop.permute.xlu1 %324  ;;  %v331_v44 = vsel %vm46_vm0, %v329_v41, %v323_v40 }
 0x3a4   :  { %v332_v45 = vsel %vm46_vm0, %v330_v42, %v325_v43  ;;  %v334_v46 = vsel %vm333_vm7, %v331_v44, 0.0 }
 0x3a5   :  { %v335_v47 = vsel %vm333_vm7, %v332_v45, 0.0  ;;  %336 = vst [vmem:[#allocation2] sm:$0xff] %v334_v46 }
 0x3a6   :  { %337 = vst [vmem:[#allocation2 + $0x8] sm:$0xff] %v335_v47 }
 0x3a7   :  { %462 = shalt.err (!%p459_p4)
}
 0x3a8   :  { %s463_s1 = scalar_lea.hbm %s603_s6, 256 }
 0x3a9   :  { %p464_p5 = scmp.ne.s32.totalorder %s603_s6, %s463_s1  ;;  %p467_p6 = scmp.lt.u32.totalorder %s463_s1, %s603_s6 }
 0x3ab   :  { %p469_p7 = pnand %p467_p6, %p464_p5 }
 0x3ad   :  { %472 = shalt.err (!%p469_p7)
}
 0x3ae   :  { %s478_s12 = smov 128   ;;  %s479_s13 = smov 8  }
 0x3af   :  { %349 = dma.vmem_to_hbm [thread:$0]  %s344_s30, 256, %s603_s6, [#allocation3], %s478_s12, %s478_s12, %s479_s13  }
 0x3b0   :  { %473 = dma.done.wait [#allocation3], 256  }
 0x3b1   :  { %474 = vsyncadd [#allocation3], 4294967040 }
 0x3b2   :  { %353 = vsyncpa [#allocation3], 1 }

// kernel: tpu_custom_call.1
= control target key start
LH: loop header
LB: loop body
LE: loop exit
PB: predicated region body
PF: predicated region fallthrough
CT: control target
= control target key end

     0   :  { %vm46_vm0 = vcmask 261120   ;;  %s597_s0 = inlined_call_operand.vmem [shape: f32[16,32], index: 0, kind: input, shape index: {}]   ;;  %s598_s1 = inlined_call_operand.vmem [shape: f32[32,64], index: 1, kind: input, shape index: {}]   ;;  %s599_s2 = inlined_call_operand.vmem [shape: f32[1,64], index: 2, kind: input, shape index: {}]   ;;  %s600_s3 = inlined_call_operand.vmem [shape: f32[64,32], index: 3, kind: input, shape index: {}]   ;;  %s601_s4 = inlined_call_operand.vmem [shape: f32[1,32], index: 4, kind: input, shape index: {}]   ;;  %s602_s5 = inlined_call_operand.vmem [shape: f32[16,16], index: 5, kind: input, shape index: {}]   ;;  %s603_s6 = inlined_call_operand.hbm [shape: f32[16,128], index: 6, kind: output, shape index: {}]  }
   0x1   :  { %v26_v0 = vld [vmem:[%s598_s1] sm:$0xff]  ;;  %v27_v1 = vld [vmem:[%s598_s1 + $0x8] sm:$0xff]  ;;  %v28_v2 = vld [vmem:[%s598_s1 + $0x10] sm:$0xff] }
   0x2   :  { %v406_v3 = vpack.c.bf16 %v27_v1, %v26_v0  ;;  %v29_v4 = vld [vmem:[%s598_s1 + $0x18] sm:$0xff]  ;;  %v24_v5 = vld [vmem:[%s597_s0] sm:$0xff] }
   0x3   :  { %v410_v6 = vpack.c.bf16 %v29_v4, %v28_v2  ;;  %384 = vmatprep.mubr.msk.f32.mxu0 %vm46_vm0, %v24_v5 }
   0x4   :  { %11 = vsyncpa [#allocation3], 0  ;;  %407 = vmatprep.subr.bf16.mxu0 %v406_v3  ;;  %v25_v7 = vld [vmem:[%s597_s0 + $0x8] sm:$0xff]  ;;  %v354_v8 = vld [vmem:[%s599_s2] ss:$0 sm:$0xff]  ;;  %vm128_vm1 = vcmask 523264  }
   0x5   :  { %409 = vmatpush3.bf16.msra.mxu0 %v406_v3  ;;  %v31_v25 = vld [vmem:[%s600_s3] sm:$0xff]  ;;  %v32_v26 = vld [vmem:[%s600_s3 + $0x8] sm:$0xff]  ;;  %v33_v27 = vld [vmem:[%s600_s3 + $0x10] sm:$0xff]  ;;  %s475_s28 = smov 16   ;;  %vm328_vm6 = vcmask 130048   ;;  %s477_s29 = smov [#allocation2]  }
   0x6   :  { %411 = vmatprep.subr.bf16.mxu0 %v410_v6  ;;  %v414_v28 = vpack.c.bf16 %v32_v26, %v31_v25  ;;  %v34_v29 = vld [vmem:[%s600_s3 + $0x18] sm:$0xff]  ;;  %v35_v31 = vld [vmem:[%s600_s3 + $0x20] sm:$0xff]  ;;  %v36_v32 = vld [vmem:[%s600_s3 + $0x28] sm:$0xff]  ;;  %s343_s30 = sshll.u32 %s477_s29, 4  ;;  %vm333_vm7 = vcmask 392192   ;;  %s344_s30 = int_to_ptr.vmem [resolvable:$true] %s343_s30 }
   0x7   :  { %v418_v30 = vpack.c.bf16 %v34_v29, %v33_v27  ;;  %v422_v33 = vpack.c.bf16 %v36_v32, %v35_v31  ;;  %v37_v34 = vld [vmem:[%s600_s3 + $0x30] sm:$0xff]  ;;  %v38_v35 = vld [vmem:[%s600_s3 + $0x38] sm:$0xff]  ;;  %v291_v37 = vld [vmem:[%s602_s5 + $0x8] sm:$0xff]  ;;  %s451_s7 = scalar_lea.vmem %s344_s30, 256  ;;  %p456_p1 = scmp.lt.s32.totalorder %s344_s30, %s344_s30 }
   0x8   :  { %415 = vmatprep.subr.bf16.mxu1 %v414_v28  ;;  %v426_v36 = vpack.c.bf16 %v38_v35, %v37_v34  ;;  %v290_v38 = vld [vmem:[%s602_s5] sm:$0xff]  ;;  %p452_p0 = scmp.ne.s32.totalorder %s344_s30, %s451_s7  ;;  %p457_p2 = scmp.lt.s32.totalorder %s451_s7, %s451_s7 }
   0x9   :  { %413 = vmatpush3.bf16.msra.mxu0 %v410_v6  ;;  %417 = vmatpush3.bf16.msra.mxu1 %v414_v28  ;;  %v357_v59 = vld [vmem:[%s601_s4] ss:$0 sm:$0xff]  ;;  %s476_s4 = smov 112  }
   0xa   :  { %419 = vmatprep.subr.bf16.mxu1 %v418_v30  ;;  %p458_p3 = por %p457_p2, %p456_p1 }
   0xc   :  { %385 = vmatmul.mubr.msk.f32.vlgmr.msra.gmra.mrb[0].mxu0 %vm46_vm0, %v25_v7  ;;  %p459_p4 = pnand %p458_p3, %p452_p0 }
   0xd   :  { %421 = vmatpush3.bf16.msra.mxu1 %v418_v30 }
   0xe   :  { %423 = vmatprep.subr.bf16.mxu1 %v422_v33 }
  0x11   :  { %425 = vmatpush3.bf16.msra.mxu1 %v422_v33 }
  0x12   :  { %427 = vmatprep.subr.bf16.mxu1 %v426_v36 }
  0x15   :  { %429 = vmatpush3.bf16.msra.mxu1 %v426_v36 }
  0xdf   :  { %v386_v9 = vpop.f32.mrb[0].mxu0 }
  0xe0   :  { %v119_v10 = vpop.f32.mrb[1].mxu0  ;;  %v125_v12 = vadd.f32 %v386_v9, %v354_v8 }
  0xe1   :  { %v120_v11 = vadd.f32 %v354_v8, %v119_v10 }
  0xe2   :  { %v132_v14 = vsel %vm128_vm1, %v125_v12, 0.0 }
  0xe3   :  { %v129_v13 = vsel %vm128_vm1, %v120_v11, 0.0 }
  0xe4   :  { %130 = vadd.xlane.f32.xlu0 %v129_v13 }
  0xe8   :  { %133 = vadd.xlane.f32.xlu0 %v132_v14 }
  0xfe   :  { %294 = vrot.lane.b32.xlu0 %v290_v38, %s475_s28 }
 0x171   :  { %v131_v15 = vpop.xlane.xlu0 %130 }
 0x172   :  { %v136_v16 = vmul.f32 0.015625, %v131_v15 }
 0x174   :  { %v138_v17 = vsub.f32 %v120_v11, %v136_v16 }
 0x175   :  { %v134_v18 = vpop.xlane.xlu0 %133 }
 0x176   :  { %v137_v19 = vmul.f32 0.015625, %v134_v18  ;;  %v140_v20 = vmul.f32 %v138_v17, %v138_v17 }
 0x178   :  { %v139_v21 = vsub.f32 %v125_v12, %v137_v19  ;;  %v142_v22 = vsel %vm128_vm1, %v140_v20, 0.0 }
 0x179   :  { %143 = vadd.xlane.f32.xlu1 %v142_v22  ;;  %v295_v32 = vpop.permute.xlu0 %294 }
 0x17a   :  { %v141_v23 = vmul.f32 %v139_v21, %v139_v21 }
 0x17c   :  { %v145_v24 = vsel %vm128_vm1, %v141_v23, 0.0 }
 0x17d   :  { %146 = vadd.xlane.f32.xlu1 %v145_v24 }
 0x18e   :  { %296 = vrot.lane.b32.xlu1 %v291_v37, %s475_s28 }
 0x206   :  { %v144_v39 = vpop.xlane.xlu1 %143 }
 0x207   :  { %v148_v40 = vmul.f32 0.015625, %v144_v39 }
 0x209   :  { %v150_v41 = vadd.f32 1e-05, %v148_v40 }
 0x20a   :  { %v147_v42 = vpop.xlane.xlu1 %146 }
 0x20b   :  { %435 = vrsqrt.f32 %v150_v41  ;;  %v149_v43 = vmul.f32 0.015625, %v147_v42 }
 0x20d   :  { %v151_v44 = vadd.f32 1e-05, %v149_v43 }
 0x20e   :  { %v297_v26 = vpop.permute.xlu1 %296 }
 0x20f   :  { %437 = vrsqrt.f32 %v151_v44 }
 0x215   :  { %v436_v45 = vpop.eup %435 }
 0x216   :  { %v154_v46 = vmul.f32 %v436_v45, %v138_v17 }
 0x218   :  { %v159_v47 = vmul.f32 0.70710677, %v154_v46  ;;  %v156_v52 = vmul.f32 0.5, %v154_v46 }
 0x219   :  { %v438_v48 = vpop.eup %437 }
 0x21a   :  { %439 = verf.f32 %v159_v47  ;;  %v155_v49 = vmul.f32 %v438_v48, %v139_v21 }
 0x21c   :  { %v160_v50 = vmul.f32 0.70710677, %v155_v49  ;;  %v157_v56 = vmul.f32 0.5, %v155_v49 }
 0x21e   :  { %441 = verf.f32 %v160_v50 }
 0x224   :  { %v440_v51 = vpop.eup %439 }
 0x225   :  { %v163_v53 = vadd.f32 1.0, %v440_v51 }
 0x227   :  { %v165_v54 = vmul.f32 %v163_v53, %v156_v52 }
 0x228   :  { %v442_v55 = vpop.eup %441 }
 0x229   :  { %403 = vmatprep.mubr.msk.f32.mxu1 %vm128_vm1, %v165_v54  ;;  %v164_v57 = vadd.f32 1.0, %v442_v55 }
 0x22b   :  { %v166_v58 = vmul.f32 %v164_v57, %v157_v56 }
 0x22d   :  { %404 = vmatmul.mubr.msk.f32.vlgmr.msra.gmra.mrb[0].mxu1 %vm128_vm1, %v166_v58 }
 0x300   :  { %v405_v60 = vpop.f32.mrb[0].mxu1 }
 0x301   :  { %v251_v61 = vadd.f32 %v405_v60, %v357_v59  ;;  %v245_v62 = vpop.f32.mrb[1].mxu1 }
 0x302   :  { %v246_v63 = vadd.f32 %v357_v59, %v245_v62 }
 0x303   :  { %v261_v0 = vand.u32 2147483647, %v251_v61  ;;  %316 = vrot.lane.b32.xlu1 %v251_v61, %s475_s28  ;;  %v255_v20 = vmax.f32 %v251_v61, 0.0  ;;  %vm257_vm4 = vcmp.ne.f32.partialorder %v251_v61, %v251_v61 }
 0x304   :  { %v260_v1 = vand.u32 2147483647, %v246_v63  ;;  %314 = vrot.lane.b32.xlu0 %v246_v63, %s475_s28  ;;  %v254_v24 = vmax.f32 %v246_v63, 0.0  ;;  %vm256_vm5 = vcmp.ne.f32.partialorder %v246_v63, %v246_v63 }
 0x305   :  { %v263_v2 = vsub.f32 0.0, %v261_v0 }
 0x306   :  { %v262_v3 = vsub.f32 0.0, %v260_v1 }
 0x307   :  { %v266_v4 = vmul.f32 1.442695, %v263_v2 }
 0x308   :  { %v264_v5 = vmul.f32 1.442695, %v262_v3 }
 0x309   :  { %443 = vpow2.f32 %v266_v4 }
 0x30a   :  { %445 = vpow2.f32 %v264_v5 }
 0x313   :  { %v444_v6 = vpop.eup %443 }
 0x314   :  { %v446_v7 = vpop.eup %445  ;;  %v277_v8 = vadd.f32 1.0, %v444_v6  ;;  %v280_v10 = vmul.f32 -0.5, %v444_v6  ;;  %v283_v13 = vand.u32 2147483647, %v444_v6 }
 0x315   :  { %v268_v9 = vadd.f32 1.0, %v446_v7  ;;  %v271_v11 = vmul.f32 -0.5, %v446_v7  ;;  %v274_v15 = vand.u32 2147483647, %v446_v7 }
 0x316   :  { %447 = vlog2.f32 %v277_v8  ;;  %v281_v12 = vadd.f32 1.0, %v280_v10  ;;  %vm284_vm2 = vcmp.lt.f32.partialorder %v283_v13, 0.0004427343 }
 0x317   :  { %449 = vlog2.f32 %v268_v9  ;;  %v272_v14 = vadd.f32 1.0, %v271_v11  ;;  %vm275_vm3 = vcmp.lt.f32.partialorder %v274_v15, 0.0004427343 }
 0x318   :  { %v282_v19 = vmul.f32 %v444_v6, %v281_v12 }
 0x319   :  { %v273_v22 = vmul.f32 %v446_v7, %v272_v14 }
 0x320   :  { %v448_v16 = vpop.eup %447 }
 0x321   :  { %v450_v17 = vpop.eup %449  ;;  %v279_v18 = vmul.f32 0.6931472, %v448_v16 }
 0x322   :  { %v270_v21 = vmul.f32 0.6931472, %v450_v17 }
 0x323   :  { %v285_v23 = vsel %vm284_vm2, %v282_v19, %v279_v18 }
 0x324   :  { %v287_v25 = vadd.f32 %v285_v23, %v255_v20  ;;  %v276_v27 = vsel %vm275_vm3, %v273_v22, %v270_v21 }
 0x325   :  { %v286_v28 = vadd.f32 %v276_v27, %v254_v24 }
 0x326   :  { %v289_v29 = vsel %vm257_vm4, %v251_v61, %v287_v25 }
 0x327   :  { %v301_v30 = vmul.f32 %v297_v26, %v289_v29  ;;  %v288_v31 = vsel %vm256_vm5, %v246_v63, %v286_v28 }
 0x328   :  { %322 = vrot.lane.b32.xlu0 %v288_v31, %s475_s28  ;;  %v300_v33 = vmul.f32 %v295_v32, %v288_v31 }
 0x329   :  { %306 = vrot.lane.b32.xlu1 %v301_v30, %s476_s4 }
 0x32d   :  { %304 = vrot.lane.b32.xlu1 %v300_v33, %s476_s4 }
 0x331   :  { %324 = vrot.lane.b32.xlu1 %v289_v29, %s475_s28 }
 0x375   :  { %v317_v34 = vpop.permute.xlu1 %316 }
 0x376   :  { %v315_v36 = vpop.permute.xlu0 %314 }
 0x39a   :  { %v323_v40 = vpop.permute.xlu0 %322 }
 0x39b   :  { %v307_v35 = vpop.permute.xlu1 %306 }
 0x39c   :  { %v311_v37 = vadd.f32 %v307_v35, %v251_v61 }
 0x39e   :  { %v330_v42 = vsel %vm328_vm6, %v311_v37, %v317_v34 }
 0x39f   :  { %v305_v38 = vpop.permute.xlu1 %304 }
 0x3a0   :  { %v310_v39 = vadd.f32 %v305_v38, %v246_v63 }
 0x3a2   :  { %v329_v41 = vsel %vm328_vm6, %v310_v39, %v315_v36 }
 0x3a3   :  { %v325_v43 = vpop.permute.xlu1 %324  ;;  %v331_v44 = vsel %vm46_vm0, %v329_v41, %v323_v40 }
 0x3a4   :  { %v332_v45 = vsel %vm46_vm0, %v330_v42, %v325_v43  ;;  %v334_v46 = vsel %vm333_vm7, %v331_v44, 0.0 }
 0x3a5   :  { %v335_v47 = vsel %vm333_vm7, %v332_v45, 0.0  ;;  %336 = vst [vmem:[#allocation2] sm:$0xff] %v334_v46 }
 0x3a6   :  { %337 = vst [vmem:[#allocation2 + $0x8] sm:$0xff] %v335_v47 }
 0x3a7   :  { %462 = shalt.err (!%p459_p4)
}
 0x3a8   :  { %s463_s1 = scalar_lea.hbm %s603_s6, 256 }
 0x3a9   :  { %p464_p5 = scmp.ne.s32.totalorder %s603_s6, %s463_s1  ;;  %p467_p6 = scmp.lt.u32.totalorder %s463_s1, %s603_s6 }
 0x3ab   :  { %p469_p7 = pnand %p467_p6, %p464_p5 }
 0x3ad   :  { %472 = shalt.err (!%p469_p7)
}
 0x3ae   :  { %s478_s12 = smov 128   ;;  %s479_s13 = smov 8  }
 0x3af   :  { %349 = dma.vmem_to_hbm [thread:$0]  %s344_s30, 256, %s603_s6, [#allocation3], %s478_s12, %s478_s12, %s479_s13  }
 0x3b0   :  { %473 = dma.done.wait [#allocation3], 256  }
 0x3b1   :  { %474 = vsyncadd [#allocation3], 4294967040 }
 0x3b2   :  { %353 = vsyncpa [#allocation3], 1 }

</bundles_post_ra>
